<compile_context>
chip_gen: v5e
topology: v5e:2x2
jax: 0.10.0
libtpu: 0.0.40
codegen_flags: <defaults>
</compile_context>

<pallas_src>
import functools

import jax
import jax.numpy as jnp
from jax.experimental import pallas as pl
from jax.experimental.pallas import tpu as pltpu


# ----------------------- small synthetic config -----------------------------
class SmallMobileViTConfig:
    img_size = 32          # small stand-in for 224
    patch_size = 8         # small stand-in for 16
    num_patches = (img_size // patch_size) ** 2   # 16
    embed_dim = 128        # small stand-in for 768
    in_chans = 3


def _round_up(x, m):
    return ((x + m - 1) // m) * m


# ------------------------------ Pallas kernel --------------------------------
def patch_embed_kernel(p_ref, w_ref, b_ref, o_ref):
    # p_ref: (1, np, Kp) patches of one image (compute dtype)
    # w_ref: (Kp, D)     projection (compute dtype), grid-invariant
    # b_ref: (1, D)      bias (f32), grid-invariant
    # o_ref: (1, np, D)  output (out dtype)
    acc = jnp.dot(p_ref[0], w_ref[...], preferred_element_type=jnp.float32)
    o_ref[0] = (acc + b_ref[...]).astype(o_ref.dtype)


# -------------------- one-time parameter preparation -------------------------
def prepare_patch_embed_params(weight, bias, compute_dtype=jnp.bfloat16):
    """Conv weight (D, C, ps, ps) -> matmul weight (Kp, D) in (c, kh, kw) row
    order, zero-padded so Kp is a multiple of 128. Done once, outside the
    per-call hot path."""
    D, C, ps, _ = weight.shape
    K = C * ps * ps
    Kp = _round_up(K, 128)
    w_mat = jnp.transpose(weight.reshape(D, K))                 # (K, D)
    w_mat = jnp.pad(w_mat, ((0, Kp - K), (0, 0))).astype(compute_dtype)
    b_row = bias.reshape(1, D).astype(jnp.float32)
    return w_mat, b_row


# ------------------------------ forward pass ---------------------------------
@functools.partial(jax.jit,
                   static_argnames=("patch_size", "compute_dtype", "out_dtype"))
def patch_embedding(x, w_mat, b_row, *, patch_size,
                    compute_dtype=jnp.bfloat16, out_dtype=jnp.bfloat16):
    """x: (B, C, H, W) NCHW (f32 or bf16). w_mat: (Kp, D) prepared weight.
    b_row: (1, D). Returns (B, num_patches, D) matching
    conv(x).flatten(2).transpose(1, 2)."""
    B, C, H, W = x.shape
    ps = patch_size
    Hp, Wp = H // ps, W // ps
    num_patches = Hp * Wp
    K = C * ps * ps
    Kp, D = w_mat.shape

    # Patchify glue: single fused XLA producer (transpose + pad + cast) that
    # writes the compute-dtype patch tensor once, lane-dense and K-last, so the
    # per-step DMA into the kernel is full-width and unmasked.
    patches = x.reshape(B, C, Hp, ps, Wp, ps).transpose(0, 2, 4, 1, 3, 5)
    patches = patches.reshape(B, num_patches, K)
    patches = jnp.pad(patches, ((0, 0), (0, 0), (0, Kp - K))).astype(compute_dtype)

    # One grid step per image: block covers the full patch axis, so the output
    # is exactly (B, num_patches, D) — no M padding, no post-kernel slice copy.
    out = pl.pallas_call(
        patch_embed_kernel,
        out_shape=jax.ShapeDtypeStruct((B, num_patches, D), out_dtype),
        grid_spec=pltpu.PrefetchScalarGridSpec(
            num_scalar_prefetch=0,
            grid=(B,),
            in_specs=[
                pl.BlockSpec((1, num_patches, Kp), lambda b: (b, 0, 0)),
                # Grid-invariant -> single buffer (saves dead VMEM).
                pl.BlockSpec((Kp, D), lambda b: (0, 0),
                             pipeline_mode=pl.Buffered(1)),
                pl.BlockSpec((1, D), lambda b: (0, 0),
                             pipeline_mode=pl.Buffered(1)),
            ],
            out_specs=pl.BlockSpec((1, num_patches, D), lambda b: (b, 0, 0)),
        ),
        compiler_params=pltpu.CompilerParams(
            dimension_semantics=("parallel",)),
    )(patches, w_mat, b_row)
    return out


# ------------------------------ reference ------------------------------------
def patch_embedding_ref(x, weight, bias, config):
    """Pure-JAX reference replicating nn.Conv2d(stride=kernel) + flatten + transpose."""
    ps = config.patch_size
    out = jax.lax.conv_general_dilated(
        x, weight,
        window_strides=(ps, ps),
        padding="VALID",
        dimension_numbers=("NCHW", "OIHW", "NCHW"),
    )
    out = out + bias.reshape(1, -1, 1, 1)
    B, D, Hp, Wp = out.shape
    return out.reshape(B, D, Hp * Wp).transpose(0, 2, 1)


# -------------------------------- main ---------------------------------------
if __name__ == "__main__":
    cfg = SmallMobileViTConfig()

    key = jax.random.PRNGKey(0)
    kx, kw, kb = jax.random.split(key, 3)

    B = 2
    x = jax.random.normal(kx, (B, cfg.in_chans, cfg.img_size, cfg.img_size),
                          dtype=jnp.float32)
    # shapes from nn.Conv2d(3, embed_dim, kernel=ps, stride=ps)
    weight = jax.random.normal(
        kw, (cfg.embed_dim, cfg.in_chans, cfg.patch_size, cfg.patch_size),
        dtype=jnp.float32) * 0.02
    bias = jax.random.normal(kb, (cfg.embed_dim,), dtype=jnp.float32) * 0.02

    ref = patch_embedding_ref(x, weight, bias, cfg)

    # --- bf16 compute + bf16 output (default fast path) ----------------------
    w_bf16, b_row = prepare_patch_embed_params(weight, bias,
                                               compute_dtype=jnp.bfloat16)
    out_bf16 = patch_embedding(x, w_bf16, b_row, patch_size=cfg.patch_size,
                               compute_dtype=jnp.bfloat16,
                               out_dtype=jnp.bfloat16)
    out_bf16 = jax.block_until_ready(out_bf16)
    assert out_bf16.shape == (B, cfg.num_patches, cfg.embed_dim), out_bf16.shape
    assert jnp.allclose(out_bf16.astype(jnp.float32), ref, atol=2e-2, rtol=2e-2), \
        f"bf16 max abs err: {jnp.max(jnp.abs(out_bf16.astype(jnp.float32) - ref))}"

    # --- f32 path: tight numerical check of the kernel itself ---------------
    w_f32, b_row32 = prepare_patch_embed_params(weight, bias,
                                                compute_dtype=jnp.float32)
    out_f32 = patch_embedding(x, w_f32, b_row32, patch_size=cfg.patch_size,
                              compute_dtype=jnp.float32,
                              out_dtype=jnp.float32)
    out_f32 = jax.block_until_ready(out_f32)
    assert jnp.allclose(out_f32, ref, atol=1e-4, rtol=1e-4), \
        f"f32 max abs err: {jnp.max(jnp.abs(out_f32 - ref))}"

    print("KERNEL_OK")
</pallas_src>

<mosaic_0001>
module attributes {stable_mosaic.version = 11 : i64} {
  func.func @patch_embed_kernel(%arg0: i32, %arg1: memref<1x16x256xbf16, #tpu.memory_space<vmem>>, %arg2: memref<256x128xbf16, #tpu.memory_space<vmem>>, %arg3: memref<1x128xf32, #tpu.memory_space<vmem>>, %arg4: memref<1x16x128xbf16, #tpu.memory_space<vmem>>) attributes {dimension_semantics = [#tpu.dimension_semantics<parallel>], iteration_bounds = array<i64: 2>, scalar_prefetch = 0 : i64, scratch_operands = 0 : i64, tpu.core_type = #tpu.core_type<tc>, window_params = [{transform_indices = @transform_0, window_bounds = array<i64: 1, 16, 256>}, {pipeline_mode = #tpu.pipeline_mode<synchronous>, transform_indices = @transform_1, window_bounds = array<i64: 256, 128>}, {pipeline_mode = #tpu.pipeline_mode<synchronous>, transform_indices = @transform_2, window_bounds = array<i64: 1, 128>}, {transform_indices = @transform_3, window_bounds = array<i64: 1, 16, 128>}]} {
    %c0 = arith.constant 0 : index
    %c0_0 = arith.constant 0 : index
    %c0_1 = arith.constant 0 : index
    %0 = vector.load %arg1[%c0, %c0_0, %c0_1] : memref<1x16x256xbf16, #tpu.memory_space<vmem>>, vector<1x16x256xbf16>
    %1 = vector.shape_cast %0 : vector<1x16x256xbf16> to vector<16x256xbf16>
    %c0_2 = arith.constant 0 : index
    %c0_3 = arith.constant 0 : index
    %2 = vector.load %arg2[%c0_2, %c0_3] : memref<256x128xbf16, #tpu.memory_space<vmem>>, vector<256x128xbf16>
    %cst = arith.constant dense<0.000000e+00> : vector<16x128xf32>
    %3 = tpu.matmul %1, %2, %cst {dimension_numbers = #tpu.dot_dimension_numbers<[1], [0], [0], [1], [0, 0, 1, 1], [], []>} : vector<16x256xbf16>, vector<256x128xbf16>, vector<16x128xf32> -> vector<16x128xf32>
    %c0_4 = arith.constant 0 : index
    %c0_5 = arith.constant 0 : index
    %4 = vector.load %arg3[%c0_4, %c0_5] : memref<1x128xf32, #tpu.memory_space<vmem>>, vector<1x128xf32>
    %5 = vector.broadcast %4 : vector<1x128xf32> to vector<16x128xf32>
    %6 = arith.addf %3, %5 : vector<16x128xf32>
    %7 = arith.truncf %6 : vector<16x128xf32> to vector<16x128xbf16>
    %c0_6 = arith.constant 0 : index
    %c0_7 = arith.constant 0 : index
    %c0_8 = arith.constant 0 : index
    %8 = vector.load %arg4[%c0_6, %c0_7, %c0_8] : memref<1x16x128xbf16, #tpu.memory_space<vmem>>, vector<1x16x128xbf16>
    %9 = vector.shape_cast %8 : vector<1x16x128xbf16> to vector<16x128xbf16>
    %10 = vector.shape_cast %7 : vector<16x128xbf16> to vector<1x16x128xbf16>
    tpu.vector_store %arg4[%c0_6, %c0_7, %c0_8], %10 {strides = array<i32>} : memref<1x16x128xbf16, #tpu.memory_space<vmem>>, vector<1x16x128xbf16>,
    return
  }
  func.func @transform_0(%arg0: i32) -> (i32, i32, i32) {
    %c0_i32 = arith.constant 0 : i32
    %c0_i32_0 = arith.constant 0 : i32
    %c0_i32_1 = arith.constant 0 : i32
    return %arg0, %c0_i32, %c0_i32_0 : i32, i32, i32
  }
  func.func @transform_1(%arg0: i32) -> (i32, i32) {
    %c0_i32 = arith.constant 0 : i32
    %c0_i32_0 = arith.constant 0 : i32
    %c0_i32_1 = arith.constant 0 : i32
    return %c0_i32, %c0_i32_0 : i32, i32
  }
  func.func @transform_2(%arg0: i32) -> (i32, i32) {
    %c0_i32 = arith.constant 0 : i32
    %c0_i32_0 = arith.constant 0 : i32
    %c0_i32_1 = arith.constant 0 : i32
    return %c0_i32, %c0_i32_0 : i32, i32
  }
  func.func @transform_3(%arg0: i32) -> (i32, i32, i32) {
    %c0_i32 = arith.constant 0 : i32
    %c0_i32_0 = arith.constant 0 : i32
    %c0_i32_1 = arith.constant 0 : i32
    return %arg0, %c0_i32, %c0_i32_0 : i32, i32, i32
  }
}

</mosaic_0001>

<bundles_post_ra>
// kernel: patch_embedding.1
= control target key start
LH: loop header
LB: loop body
LE: loop exit
PB: predicated region body
PF: predicated region fallthrough
CT: control target
= control target key end

     0   :  { %8 = vsyncpa [#allocation3], 0  ;;  %s799_s0 = inlined_call_operand.vmem [shape: bf16[2,16,256], index: 0, kind: input, shape index: {}]   ;;  %s800_s1 = inlined_call_operand.vmem [shape: bf16[256,128], index: 1, kind: input, shape index: {}]   ;;  %s801_s2 = inlined_call_operand.vmem [shape: f32[1,128], index: 2, kind: input, shape index: {}]   ;;  %s802_s3 = inlined_call_operand.hbm [shape: bf16[2,16,128], index: 3, kind: output, shape index: {}]  }
   0x1   :  { %10 = vsyncpa [#allocation3 + $0x1], 0  ;;  %s660_s12 = smov 0   ;;  %s662_s13 = smov 0  }
   0x2   :  { %s664_s14 = smov 0   ;;  %s666_s15 = smov 0  }
   0x3 LB: > { %s681_s16 = sadd.s32 4294967295, %s636_s15   ;;  %s423_s17 = sadd.s32 4294967294, %s636_s15   ;;  %s636_s15 = sphi %s666_s15, %s808_s15   ;;  %s632_s14 = sphi %s664_s14, %s807_s14   ;;  %s628_s13 = sphi %s662_s13, %s806_s13   ;;  %s624_s12 = sphi %s660_s12, %s805_s12  }
   0x4   : > { %s685_s18 = sadd.s32 1, %s636_s15   ;;  %s91_s19 = sadd.s32 1, %s632_s14 }
   0x5   : > { %s88_s20 = ssub.s32 %s636_s15, %s685_s18  ;;  %p101_p0 = scmp.ne.s32.totalorder %s632_s14, %s628_s13 }
   0x6   : > { %p89_p1 = scmp.eq.s32.totalorder %s88_s20, 0  ;;  %p102_p2 = scmp.eq.s32.totalorder %s681_s16, 1 }
   0x7   : > { %p107_p3 = scmp.ne.s32.totalorder %s628_s13, %s624_s12  ;;  %p108_p4 = scmp.eq.s32.totalorder %s423_s17, 1 }
   0x8   : > { %s696_s21 = scalar_select %p89_p1, %s632_s14, %s91_s19  }
   0x9   : > { %p698_p5 = por %p102_p2, %p101_p0  ;;  %p702_p6 = por %p108_p4, %p107_p3 }
   0xa   : > { %p426_p7 = scmp.ge.s32.totalorder %s636_s15, 1  ;;  %p140_p8 = scmp.lt.s32.totalorder %s636_s15, 3 }
   0xc   : > { %p141_p9 = pnand %p426_p7, %p140_p8 }
   0xd   : > { %p164_p10 = scmp.lt.s32.totalorder (!%p141_p9), %s681_s16, 1  ;;  %s161_s25 = sand.u32 (!%p141_p9), 1, %s628_s13  }
   0xe   : > { %144 = sbr.rel (%p141_p9) target bundleno = 195 (0xc3), region = 32  ;;  %s427_s28 = sshll.u32 (!%p141_p9), %s161_s25, 3 }
   0xf   : > { %s526_s29 = sshll.u32 (!%p141_p9), %s681_s16, 3  ;;  %s163_s6 = scalar_lea.vmem (!%p141_p9), [#allocation2], %s427_s28 }
  0x10   : > { %s357_s5 = scalar_lea.hbm (!%p141_p9), %s802_s3, %s526_s29  ;;  %s769_s7 = sshll.u32 (!%p141_p9), %s163_s6, 4  ;;  %s359_s7 = int_to_ptr.vmem [resolvable:$true] %s769_s7 }
  0x11   : > { %s360_s8 = sshll.u32 (!%p141_p9), %s357_s5, 4  ;;  %s594_s19 = scalar_lea.hbm (!%p141_p9), %s802_s3, 16  ;;  %s361_s8 = int_to_ptr.hbm [resolvable:$true] %s360_s8 }
  0x12   : > { %s588_s9 = sshra.s32 (!%p141_p9), %s361_s8, 4  ;;  %s589_s9 = int_to_ptr.hbm [resolvable:$true] %s588_s9 }
  0x13   : > { %v517_v0 = vld [vmem:[%s800_s1 + $0x38] sm:$0xff]  ;;  %v516_v2 = vld [vmem:[%s800_s1 + $0x30] sm:$0xff]  ;;  %v515_v4 = vld [vmem:[%s800_s1 + $0x28] sm:$0xff]  ;;  %s165_s26 = scalar_select %p164_p10, %s681_s16, 1 }
  0x14   : > { %v525_v1 = vld [vmem:[%s800_s1 + $0x78] sm:$0xff]  ;;  %313 = vmatpush.bf16.msra.mxu0 %v517_v0  ;;  %v524_v3 = vld [vmem:[%s800_s1 + $0x70] sm:$0xff]  ;;  %v523_v5 = vld [vmem:[%s800_s1 + $0x68] sm:$0xff]  ;;  %s346_s16 = scalar_lea.sflag [#allocation3], %s161_s25  ;;  %s590_s10 = scalar_lea.hbm %s589_s9, 8 }
  0x15   : > { %327 = vmatpush.bf16.msra.mxu1 %v525_v1  ;;  %v514_v6 = vld [vmem:[%s800_s1 + $0x20] sm:$0xff]  ;;  %v513_v8 = vld [vmem:[%s800_s1 + $0x18] sm:$0xff]  ;;  %v512_v10 = vld [vmem:[%s800_s1 + $0x10] sm:$0xff]  ;;  %s507_s4 = sshll.u32 %s165_s26, 4  ;;  %p591_p11 = scmp.ne.s32.totalorder %s589_s9, %s590_s10 }
  0x16   : > { %v522_v7 = vld [vmem:[%s800_s1 + $0x60] sm:$0xff]  ;;  %v521_v9 = vld [vmem:[%s800_s1 + $0x58] sm:$0xff]  ;;  %v520_v11 = vld [vmem:[%s800_s1 + $0x50] sm:$0xff]  ;;  %s168_s11 = scalar_lea.vmem %s799_s0, %s507_s4  ;;  %p595_p0 = scmp.lt.s32.totalorder %s589_s9, %s802_s3 }
  0x17   : > { %v511_v12 = vld [vmem:[%s800_s1 + $0x8] sm:$0xff]  ;;  %v510_v14 = vld [vmem:[%s800_s1] sm:$0xff]  ;;  %p592_p12 = pnand %p591_p11, %p698_p5  ;;  %p596_p1 = scmp.lt.s32.totalorder %s594_s19, %s590_s10 }
  0x18   : > { %314 = vmatpush.bf16.msra.mxu0 %v516_v2  ;;  %v519_v13 = vld [vmem:[%s800_s1 + $0x48] sm:$0xff]  ;;  %v518_v15 = vld [vmem:[%s800_s1 + $0x40] sm:$0xff] }
  0x19   : > { %328 = vmatpush.bf16.msra.mxu1 %v524_v3  ;;  %v432_v16 = vld [vmem:[%s168_s11] sm:$0xf]  ;;  %v509_v17 = vld [vmem:[%s168_s11 + $0x4] sm:$0xf0]  ;;  %v508_v18 = vld [vmem:[%s168_s11 + $0x4] sm:$0xf]  ;;  %p593_p13 = pneg %p592_p12  ;;  %p597_p2 = por %p596_p1, %p595_p0 }
  0x1a   : > { %v434_v19 = vld [vmem:[%s168_s11 + $0x8] sm:$0xf0]  ;;  %v433_v20 = vor.u32 %v509_v17, %v432_v16  ;;  %v573_v24 = vld [vmem:[%s801_s2] ss:$0 sm:$0xff] }
  0x1b   : > { %v437_v21 = vor.u32 %v508_v18, %v434_v19  ;;  %p598_p3 = pnand %p597_p2, %p593_p13 }
  0x1c   : > { %315 = vmatpush.bf16.msra.mxu0 %v515_v4 }
  0x1d   : > { %329 = vmatpush.bf16.msra.mxu1 %v523_v5 }
  0x20   : > { %316 = vmatpush.bf16.msra.mxu0 %v514_v6 }
  0x21   : > { %330 = vmatpush.bf16.msra.mxu1 %v522_v7 }
  0x24   : > { %317 = vmatpush.bf16.msra.mxu0 %v513_v8 }
  0x25   : > { %331 = vmatpush.bf16.msra.mxu1 %v521_v9 }
  0x28   : > { %318 = vmatpush.bf16.msra.mxu0 %v512_v10 }
  0x29   : > { %332 = vmatpush.bf16.msra.mxu1 %v520_v11 }
  0x2c   : > { %319 = vmatpush.bf16.msra.mxu0 %v511_v12 }
  0x2d   : > { %333 = vmatpush.bf16.msra.mxu1 %v519_v13 }
  0x30   : > { %320 = vmatpush.bf16.msra.mxu0 %v510_v14 }
  0x31   : > { %334 = vmatpush.bf16.msra.mxu1 %v518_v15 }
  0x33   : > { %321 = vmatmul.bf16.vlgmr.msra.gmra.mxu0 %v433_v20 }
  0x34   : > { %335 = vmatmul.bf16.vlgmr.msra.gmra.mxu1 %v437_v21 }
  0xb0   : > { %v322_v22 = vpop.f32.mrf.mxu0 }
  0xb1   : > { %v336_v23 = vpop.f32.mrf.mxu1  ;;  %v323_v25 = vadd.f32 %v573_v24, %v322_v22 }
  0xb3   : > { %v337_v29 = vadd.f32 %v336_v23, %v323_v25 }
  0xb8   : > { %v324_v26 = vpop.f32.mrf.mxu0 }
  0xb9   : > { %v325_v27 = vadd.f32 %v573_v24, %v324_v26  ;;  %v338_v28 = vpop.f32.mrf.mxu1 }
  0xbb   : > { %v339_v30 = vadd.f32 %v338_v28, %v325_v27 }
  0xbd   : > { %v530_v31 = vpack.c.bf16 %v339_v30, %v337_v29 }
  0xbf   : > { %531 = vst [vmem:[%s163_s6] sm:$0xff] %v530_v31  }
  0xc0   : > { %601 = shalt.err (!%p598_p3)
}
  0xc1   : > { %s638_s25 = smov 64   ;;  %s639_s26 = smov 4  }
  0xc2   : > { %532 = dma.vmem_to_hbm [thread:$0]  (%p698_p5), %s359_s7, 128, %s361_s8, %s346_s16, %s638_s25, %s638_s25, %s639_s26  }
  0xc3 PF: > { %p538_p4 = scmp.ge.s32.totalorder %s636_s15, 2  ;;  %s375_s27 = sand.u32 1, %s624_s12  }
  0xc4   : > { %s376_s28 = scalar_lea.sflag [#allocation3], %s375_s27 }
  0xc5   : > { %p535_p7 = pnand %p538_p4, %p702_p6 }
  0xc7   : > { %p536_p8 = pneg %p535_p7 }
  0xc9   : > { %619 = dma.done.wait (%p536_p8), %s376_s28, 128  }
  0xca   : > { %621 = vsyncadd (%p536_p8), %s376_s28, 4294967168  ;;  %p13_p9 = scmp.ge.s32.totalorder %s685_s18, 4   ;;  %s805_s12 = smov %s628_s13 }
  0xcb   : > { %s806_s13 = smov %s632_s14  ;;  %s807_s14 = smov %s696_s21 }
  0xcc   : > { %s808_s15 = smov %s685_s18  ;;  %15 = sbr.rel (!%p13_p9) target bundleno = 3 (0x3), region = 67 }
  0xd1   :  { %382 = vsyncpa [#allocation3], 1 }
  0xd2   :  { %384 = vsyncpa [#allocation3 + $0x1], 1 }

</bundles_post_ra>
